<compile_context>
chip_gen: v6e
topology: v6e:2x2x1
jax: 0.10.0
libtpu: 0.0.40
codegen_flags: <defaults>
</compile_context>

<pallas_src>
import functools
import math

import jax
import jax.numpy as jnp
from jax.experimental import pallas as pl
from jax.experimental.pallas import tpu as pltpu


def _build_pe_table(embed_dim: int, max_len: int = 5000) -> jnp.ndarray:
    """Sinusoidal PE table, shape (max_len, embed_dim), f32. Robust to odd D."""
    position = jnp.arange(max_len, dtype=jnp.float32)[:, None]            # (L, 1)
    div_term = jnp.exp(
        jnp.arange(0, embed_dim, 2, dtype=jnp.float32)
        * (-math.log(10000.0) / embed_dim)
    )                                                                     # (ceil(D/2),)
    angles = position * div_term                                          # (L, ceil(D/2))
    pe = jnp.zeros((max_len, embed_dim), dtype=jnp.float32)
    pe = pe.at[:, 0::2].set(jnp.sin(angles))
    pe = pe.at[:, 1::2].set(jnp.cos(angles[:, : embed_dim // 2]))
    return pe


def _pe_add_kernel(x_ref, pe_ref, o_ref, *, reps: int):
    # x_ref : (rt, tc)  row tile of the folded (B*k, N//k) layout
    # pe_ref: (k,  tc)  shared positional-encoding columns for one fold group
    # o_ref : (rt, tc)
    pe = pe_ref[...]
    if reps > 1:
        # Replicate the k-row pe group across the batch rows of this tile.
        # Cheap: uses idle VPU/XLU slack in a memory-bound kernel.
        pe = jnp.tile(pe, (reps, 1))
    o_ref[...] = x_ref[...] + pe            # broadcasts when pe has a single row


def _choose_fold(batch: int, n_cols: int, itemsize: int) -> int:
    """Fold factor k so x (B, N) can be viewed as (B*k, N//k) with rows filling
    the native sublane count (8 for f32, 16 for bf16) even for tiny batches."""
    sublanes = max(8, 32 // max(1, itemsize))
    if batch % sublanes == 0:
        return 1
    k = sublanes // math.gcd(batch, sublanes)   # smallest k with (B*k) % sublanes == 0
    while k > 1:
        if n_cols % k == 0:
            return k
        k //= 2                                  # partial improvement fallback
    return 1


def _target_tile_bytes() -> int:
    """Per-step x-tile byte target, TPU-generation aware."""
    try:
        kind = jax.devices()[0].device_kind.lower()
    except Exception:
        kind = ""
    if "v5" in kind:
        # v5e: 2 MiB already sits at the ~0.8 TB/s roofline and the default
        # scoped VMEM is only 16 MiB — do not copy the v6e/v7x setting.
        return 2 * 1024 * 1024
    # v6e / v7x (and unknown/newer chips): 4 MiB amortizes the ~0.35us/step
    # grid overhead at 1.4-3.2 TB/s HBM.
    return 4 * 1024 * 1024


def _plan_tiles(R: int, C: int, itemsize: int, k: int, target_bytes: int):
    """Pick (row_tile, col_tile) for the folded (R, C) layout."""
    row_align = max(8, k)
    ROW_CAP = 512                      # keeps per-row DMA segments long for big B
    rt = R if R <= ROW_CAP else ROW_CAP
    # Largest multiple-of-128 column tile such that the x tile is ~target_bytes.
    max_tc = max(128, (target_bytes // max(1, rt * itemsize)) // 128 * 128)
    tc = C if C <= max_tc else max_tc
    # v7x: give both TensorCores work when a big problem would otherwise be a
    # single grid step (the grid axes are "parallel"). No-op on v5e/v6e (1 TC).
    single_step = pl.cdiv(R, rt) == 1 and pl.cdiv(C, tc) == 1
    if single_step and R * C * itemsize >= (2 << 20):
        if C >= 256:
            tc = max(128, pl.cdiv(pl.cdiv(C, 2), 128) * 128)
        elif R >= 2 * row_align:
            rt = max(row_align, pl.cdiv(pl.cdiv(R, 2), row_align) * row_align)
    return rt, tc


def positional_encoding_forward(x: jnp.ndarray, pe_table: jnp.ndarray) -> jnp.ndarray:
    """x: (B, S, D); pe_table: (max_len, D). Returns x + pe_table[:S]."""
    B, S, D = x.shape
    max_len, d_tab = pe_table.shape
    if d_tab != D:
        raise ValueError(f"embed_dim mismatch: x has {D}, pe table has {d_tab}")
    if S > max_len:
        raise ValueError(f"sequence length {S} exceeds pe table max_len {max_len}")

    dtype = x.dtype
    itemsize = jnp.dtype(dtype).itemsize
    pe = pe_table[:S].astype(dtype)              # static slice + dtype match

    # Flatten trailing dims (lane-dense) and fold columns into rows so the
    # sublane axis is fully occupied even for small batch.
    N = S * D
    k = _choose_fold(B, N, itemsize)
    R, C = B * k, N // k
    x2 = x.reshape(R, C)                          # free row-major reshape
    pe2 = pe.reshape(k, C)                        # matching fold of the pe table

    rt, tc = _plan_tiles(R, C, itemsize, k, _target_tile_bytes())
    reps = (rt // k) if k > 1 else 1

    # Double-buffered working set (x + out + pe tiles).  Only raise the scoped
    # VMEM limit when the generation defaults (>=16 MiB) would be too small.
    vmem_needed = 2 * itemsize * tc * (2 * rt + k)
    vmem_limit = None
    if vmem_needed > (12 << 20):
        vmem_limit = min(int(vmem_needed * 3 // 2) + (1 << 20), 48 << 20)

    grid = (pl.cdiv(R, rt), pl.cdiv(C, tc))
    out = pl.pallas_call(
        functools.partial(_pe_add_kernel, reps=reps),
        out_shape=jax.ShapeDtypeStruct((R, C), dtype),
        grid=grid,
        in_specs=[
            pl.BlockSpec((rt, tc), lambda i, j: (i, j)),   # x  : folded rows, column tile
            pl.BlockSpec((k, tc), lambda i, j: (0, j)),    # pe : one fold group, same cols
        ],
        out_specs=pl.BlockSpec((rt, tc), lambda i, j: (i, j)),
        compiler_params=pltpu.CompilerParams(
            dimension_semantics=("parallel", "parallel"),  # shard tiles across TCs (v7x)
            vmem_limit_bytes=vmem_limit,
        ),
    )(x2, pe2)

    return out.reshape(B, S, D)


if __name__ == "__main__":
    # Small shapes consistent with the module: batch=2, seq=8, embed_dim=32.
    B, S, D = 2, 8, 32
    max_len = 64  # small synthetic table (>= S)

    key = jax.random.PRNGKey(0)
    x = jax.random.normal(key, (B, S, D), dtype=jnp.float32)

    pe_table = _build_pe_table(D, max_len)

    out = positional_encoding_forward(x, pe_table)
    out = jax.block_until_ready(out)

    # Sanity check against pure-JAX reference.
    ref = x + pe_table[None, :S, :]
    assert out.shape == (B, S, D)
    assert jnp.allclose(out, ref, atol=1e-6, rtol=1e-6)

    print("KERNEL_OK")
</pallas_src>

<mosaic_0001>
module attributes {stable_mosaic.version = 11 : i64} {
  func.func @_pe_add_kernel(%arg0: i32, %arg1: i32, %arg2: memref<8x64xf32, #tpu.memory_space<vmem>>, %arg3: memref<4x64xf32, #tpu.memory_space<vmem>>, %arg4: memref<8x64xf32, #tpu.memory_space<vmem>>) attributes {dimension_semantics = [#tpu.dimension_semantics<parallel>, #tpu.dimension_semantics<parallel>], iteration_bounds = array<i64: 1, 1>, scalar_prefetch = 0 : i64, scratch_operands = 0 : i64, tpu.core_type = #tpu.core_type<tc>, window_params = [{transform_indices = @transform_0, window_bounds = array<i64: 8, 64>}, {transform_indices = @transform_1, window_bounds = array<i64: 4, 64>}, {transform_indices = @transform_2, window_bounds = array<i64: 8, 64>}]} {
    %c0 = arith.constant 0 : index
    %c0_0 = arith.constant 0 : index
    %0 = vector.load %arg3[%c0, %c0_0] : memref<4x64xf32, #tpu.memory_space<vmem>>, vector<4x64xf32>
    %1 = tpu.concatenate %0, %0 in 0 : vector<4x64xf32>, vector<4x64xf32> -> vector<8x64xf32>
    %c0_1 = arith.constant 0 : index
    %c0_2 = arith.constant 0 : index
    %2 = vector.load %arg2[%c0_1, %c0_2] : memref<8x64xf32, #tpu.memory_space<vmem>>, vector<8x64xf32>
    %3 = arith.addf %2, %1 : vector<8x64xf32>
    %c0_3 = arith.constant 0 : index
    %c0_4 = arith.constant 0 : index
    %4 = vector.load %arg4[%c0_3, %c0_4] : memref<8x64xf32, #tpu.memory_space<vmem>>, vector<8x64xf32>
    tpu.vector_store %arg4[%c0_3, %c0_4], %3 {strides = array<i32>} : memref<8x64xf32, #tpu.memory_space<vmem>>, vector<8x64xf32>,
    return
  }
  func.func @transform_0(%arg0: i32, %arg1: i32) -> (i32, i32) {
    %c0_i32 = arith.constant 0 : i32
    return %arg0, %arg1 : i32, i32
  }
  func.func @transform_1(%arg0: i32, %arg1: i32) -> (i32, i32) {
    %c0_i32 = arith.constant 0 : i32
    %c0_i32_0 = arith.constant 0 : i32
    return %c0_i32, %arg1 : i32, i32
  }
  func.func @transform_2(%arg0: i32, %arg1: i32) -> (i32, i32) {
    %c0_i32 = arith.constant 0 : i32
    return %arg0, %arg1 : i32, i32
  }
}

</mosaic_0001>

<bundles_post_ra>
// kernel: tpu_custom_call.1
= control target key start
LH: loop header
LB: loop body
LE: loop exit
PB: predicated region body
PF: predicated region fallthrough
CT: control target
= control target key end

     0   :  { %7 = vsyncpa [#allocation3], 0  ;;  %s158_s0 = inlined_call_operand.hbm [shape: f32[8,64], index: 0, kind: input, shape index: {}]   ;;  %s159_s1 = inlined_call_operand.hbm [shape: f32[4,64], index: 1, kind: input, shape index: {}]   ;;  %s160_s2 = inlined_call_operand.hbm [shape: f32[8,64], index: 2, kind: output, shape index: {}]  }
   0x1   :  { %8 = vsyncpa [#allocation6], 0 }
   0x2   :  { %9 = vsyncpa [#allocation4], 0  ;;  %s131_s9 = smov [#allocation2]   ;;  %s132_s11 = smov [#allocation5]  }
   0x3   :  { %s16_s10 = sshll.u32 %s131_s9, 4  ;;  %s26_s12 = sshll.u32 %s132_s11, 4  ;;  %s17_s10 = int_to_ptr.vmem [resolvable:$true] %s16_s10  ;;  %s27_s12 = int_to_ptr.vmem [resolvable:$true] %s26_s12 }
   0x4   :  { %s73_s13 = scalar_lea.vmem %s17_s10, 128  ;;  %p78_p1 = scmp.lt.s32.totalorder %s17_s10, %s17_s10 }
   0x5   :  { %p74_p0 = scmp.ne.s32.totalorder %s17_s10, %s73_s13  ;;  %p79_p2 = scmp.lt.s32.totalorder %s73_s13, %s73_s13 }
   0x7   :  { %p80_p3 = por %p79_p2, %p78_p1 }
   0x9   :  { %p81_p4 = pnand %p80_p3, %p74_p0 }
   0xb   :  { %84 = shalt.err (!%p81_p4)
}
   0xc   :  { %19 = dma.hbm_to_vmem [thread:$0]  %s158_s0, 128, %s17_s10, [#allocation3]  }
   0xd   :  { %s93_s16 = scalar_lea.vmem %s27_s12, 64  ;;  %p98_p6 = scmp.lt.s32.totalorder %s27_s12, %s27_s12 }
   0xe   :  { %p94_p5 = scmp.ne.s32.totalorder %s27_s12, %s93_s16  ;;  %p99_p7 = scmp.lt.s32.totalorder %s93_s16, %s93_s16 }
  0x10   :  { %p100_p8 = por %p99_p7, %p98_p6 }
  0x12   :  { %p101_p9 = pnand %p100_p8, %p94_p5 }
  0x14   :  { %104 = shalt.err (!%p101_p9)
}
  0x15   :  { %29 = dma.hbm_to_vmem [thread:$0]  %s159_s1, 64, %s27_s12, [#allocation6]  }
  0x16   :  { %125 = dma.done.wait [#allocation3], 128  }
  0x17   :  { %126 = vsyncadd [#allocation3], 4294967168 }
  0x18   :  { %127 = dma.done.wait [#allocation6], 64  }
  0x19   :  { %128 = vsyncadd [#allocation6], 4294967232  ;;  %v36_v0 = vld [vmem:[#allocation5] sm:$0xf]  ;;  %vm40_vm0 = vcmask 1043456   ;;  %v42_v2 = vld [vmem:[#allocation2] sm:$0xff] }
  0x1a   :  { %v38_v1 = vrot.slane %v36_v0, 4  ;;  %s133_s0 = smov [#allocation7]   ;;  %vm44_vm1 = vcmask 523264  }
  0x1b   :  { %s52_s19 = sshll.u32 %s133_s0, 4  ;;  %s53_s19 = int_to_ptr.vmem [resolvable:$true] %s52_s19 }
  0x1c   :  { %v41_v3 = vsel %vm40_vm0, %v36_v0, %v38_v1  ;;  %s105_s20 = scalar_lea.vmem %s53_s19, 128  ;;  %p110_p11 = scmp.lt.s32.totalorder %s53_s19, %s53_s19 }
  0x1d   :  { %v43_v4 = vadd.f32 %v42_v2, %v41_v3  ;;  %p106_p10 = scmp.ne.s32.totalorder %s53_s19, %s105_s20  ;;  %p111_p12 = scmp.lt.s32.totalorder %s105_s20, %s105_s20 }
  0x1f   :  { %45 = vst.msk [vmem:[#allocation7] sm:$0xff] %vm44_vm1, %v43_v4  ;;  %p112_p13 = por %p111_p12, %p110_p11 }
  0x21   :  { %p113_p0 = pnand %p112_p13, %p106_p10 }
  0x23   :  { %116 = shalt.err (!%p113_p0)
}
  0x24   :  { %55 = dma.vmem_to_hbm [thread:$0]  %s53_s19, 128, %s160_s2, [#allocation4]  }
  0x25   :  { %129 = dma.done.wait [#allocation4], 128  }
  0x26   :  { %130 = vsyncadd [#allocation4], 4294967168 }
  0x27   :  { %59 = vsyncpa [#allocation3], 1 }
  0x28   :  { %60 = vsyncpa [#allocation6], 1 }
  0x29   :  { %61 = vsyncpa [#allocation4], 1 }

</bundles_post_ra>
